<compile_context>
chip_gen: v7x
topology: tpu7x:2x2x1
jax: 0.10.0
libtpu: 0.0.40
codegen_flags: <defaults>
</compile_context>

<pallas_src>
import functools

import jax
import jax.numpy as jnp
from jax.experimental import pallas as pl
from jax.experimental.pallas import tpu as pltpu


def _round_up(x, m):
    return (x + m - 1) // m * m


def _cdiv(a, b):
    return (a + b - 1) // b


def _block_diag(a, b):
    ra, ca = a.shape
    rb, cb = b.shape
    top = jnp.concatenate([a, jnp.zeros((ra, cb), a.dtype)], axis=1)
    bot = jnp.concatenate([jnp.zeros((rb, ca), b.dtype), b], axis=1)
    return jnp.concatenate([top, bot], axis=0)


# ---------------------------------------------------------------------------
# Pallas kernel: fused branch+trunk forward for one batch tile.
#   x = [u0 | grid]                       (tb, d_b + d_t)   f32, streamed
#   h = relu(x @ blkdiag(Wb0, Wt0) + b0)  (tb, 2H)
#   z = h @ blkdiag(Wb1, Wt1) + b1        (tb, 2P) = [branch_out | trunk_out]
#   out = rowwise_dot(z[:, :P], z[:, P:]) -> lane-dense (1, 1, tb)
# ---------------------------------------------------------------------------
def deeponet_kernel(x_ref, w0_ref, b0_ref, w1_ref, b1_ref, out_ref):
    # Layer 0 (block-diagonal fused): cast to bf16 only at the MXU boundary.
    h = jnp.dot(x_ref[...].astype(jnp.bfloat16), w0_ref[...],
                preferred_element_type=jnp.float32) + b0_ref[...]
    h = jnp.maximum(h, 0.0)                              # ReLU (f32 VPU)

    # Layer 1 (block-diagonal fused): z = [a | b]
    z = jnp.dot(h.astype(jnp.bfloat16), w1_ref[...],
                preferred_element_type=jnp.float32) + b1_ref[...]

    p = z.shape[-1] // 2
    a = z[:, :p]
    b = z[:, p:]
    # torch.bmm(a.view(B,1,P), b.view(B,P,1)) == per-row dot product.
    # Sublane->lane relayout (idle XLU) gives a lane-dense (1, 1, tb) store.
    out_ref[...] = jnp.sum(a * b, axis=-1)[None, None, :]


def prepare_deeponet_params(params):
    """One-time fusion of branch/trunk weights into block-diagonal form."""
    (wb0, bb0, wb1, bb1, wt0, bt0, wt1, bt1) = params
    w0 = _block_diag(wb0, wt0).astype(jnp.bfloat16)                # (d_in, 2H)
    w1 = _block_diag(wb1, wt1).astype(jnp.bfloat16)                # (2H, 2P)
    b0 = jnp.concatenate([bb0, bt0], axis=-1).astype(jnp.float32)  # (1, 2H)
    b1 = jnp.concatenate([bb1, bt1], axis=-1).astype(jnp.float32)  # (1, 2P)
    return w0, b0, w1, b1


@functools.partial(jax.jit, static_argnames=("block_rows",))
def deeponet_apply(u0, grid, w0, b0, w1, b1, *, block_rows=1024):
    """u0: (B, d_b), grid: (B, d_t), fused params -> (B, 1, 1) float32."""
    B = u0.shape[0]
    d_in = u0.shape[1] + grid.shape[1]
    H2 = w0.shape[1]
    P2 = w1.shape[1]

    # Single contiguous streamed input (no in-kernel concat / relayout).
    x = jnp.concatenate([u0, grid], axis=-1)                       # (B, d_in) f32

    # Balanced batch tiling: big-but-bounded tiles, keep >= 4 tiles when the
    # batch is large (v7x: 2 TCs, and leaves something to double-buffer).
    n_tiles = max(1, _cdiv(B, block_rows))
    if B >= 1024:
        n_tiles = max(n_tiles, 4)
    tb = _round_up(_cdiv(B, n_tiles), 8)
    n_tiles = _cdiv(B, tb)
    b_pad = n_tiles * tb
    if b_pad != B:
        x = jnp.pad(x, ((0, b_pad - B), (0, 0)))

    flops = 2 * b_pad * (d_in * H2 + H2 * P2) + 4 * b_pad * P2
    bytes_accessed = (b_pad * d_in * 4 + b_pad * 4
                      + (w0.size + w1.size) * 2 + (b0.size + b1.size) * 4)

    out = pl.pallas_call(
        deeponet_kernel,
        out_shape=jax.ShapeDtypeStruct((n_tiles, 1, tb), jnp.float32),
        grid_spec=pltpu.PrefetchScalarGridSpec(
            num_scalar_prefetch=0,
            grid=(n_tiles,),
            in_specs=[
                pl.BlockSpec((tb, d_in), lambda i: (i, 0)),    # streamed input
                pl.BlockSpec((d_in, H2), lambda i: (0, 0)),    # resident weight
                pl.BlockSpec((1, H2), lambda i: (0, 0)),       # resident bias
                pl.BlockSpec((H2, P2), lambda i: (0, 0)),      # resident weight
                pl.BlockSpec((1, P2), lambda i: (0, 0)),       # resident bias
            ],
            # Lane-dense output: one (1, 1, tb) slab per batch tile.
            out_specs=pl.BlockSpec((1, 1, tb), lambda i: (i, 0, 0)),
        ),
        compiler_params=pltpu.CompilerParams(
            dimension_semantics=("parallel",)),
        cost_estimate=pl.CostEstimate(
            flops=flops, transcendentals=0, bytes_accessed=bytes_accessed),
    )(x, w0, b0, w1, b1)

    # Undo the lane-dense layout: (n_tiles, 1, tb) -> row-major (b_pad,) -> (B,1,1)
    return out.reshape(b_pad)[:B].reshape(B, 1, 1)


def deeponet_forward(u0, grid, params, *, block_rows=1024):
    """Convenience one-shot wrapper (prepare fused weights + jitted apply)."""
    fused = prepare_deeponet_params(params)
    return deeponet_apply(u0, grid, *fused, block_rows=block_rows)


# ---------------------------------------------------------------------------
# Deterministic parameter construction (shapes from DenseNet __init__)
# ---------------------------------------------------------------------------
def init_dense_params(key, layers):
    """Returns [(W, b), ...] with W of shape (in, out) (i.e. W_torch.T)."""
    params = []
    for j in range(len(layers) - 1):
        key, kw, kb = jax.random.split(key, 3)
        fan_in = layers[j]
        scale = 1.0 / jnp.sqrt(jnp.float32(fan_in))
        W = jax.random.uniform(kw, (layers[j], layers[j + 1]),
                               jnp.float32, -scale, scale)
        b = jax.random.uniform(kb, (1, layers[j + 1]),
                               jnp.float32, -scale, scale)
        params.append((W, b))
    return params


def reference_forward(u0, grid, params):
    """Plain-JAX f32 reference replicating the PyTorch forward."""
    (wb0, bb0, wb1, bb1, wt0, bt0, wt1, bt1) = params
    a = jnp.maximum(u0 @ wb0 + bb0, 0.0) @ wb1 + bb1
    b = jnp.maximum(grid @ wt0 + bt0, 0.0) @ wt1 + bt1
    return jnp.sum(a * b, axis=-1).reshape(-1, 1, 1)


if __name__ == "__main__":
    # Small shapes: batch=8, branch input=16, trunk input=8, hidden=32, P=32
    B = 8
    branch_layer = [16, 32, 32]
    trunk_layer = [8, 32, 32]

    key = jax.random.PRNGKey(0)
    k_u, k_g, k_b, k_t = jax.random.split(key, 4)

    u0 = jax.random.normal(k_u, (B, branch_layer[0]), jnp.float32)
    grid = jax.random.normal(k_g, (B, trunk_layer[0]), jnp.float32)

    branch_params = init_dense_params(k_b, branch_layer)
    trunk_params = init_dense_params(k_t, trunk_layer)
    params = (branch_params[0][0], branch_params[0][1],
              branch_params[1][0], branch_params[1][1],
              trunk_params[0][0], trunk_params[0][1],
              trunk_params[1][0], trunk_params[1][1])

    # Hoisted, one-time fused weight prep; jitted apply path.
    fused = prepare_deeponet_params(params)
    out = deeponet_apply(u0, grid, *fused)
    out = jax.block_until_ready(out)

    ref = reference_forward(u0, grid, params)
    assert out.shape == (B, 1, 1), out.shape
    # bf16 MXU operands (f32 accumulation) -> loosened tolerance vs f32 ref.
    assert jnp.allclose(out, ref, atol=3e-2, rtol=3e-2), (out, ref)

    print("KERNEL_OK")
</pallas_src>

<mosaic_0001>
module attributes {stable_mosaic.version = 11 : i64} {
  func.func @deeponet_kernel(%arg0: i32, %arg1: memref<8x24xf32, #tpu.memory_space<vmem>>, %arg2: memref<24x64xbf16, #tpu.memory_space<vmem>>, %arg3: memref<1x64xf32, #tpu.memory_space<vmem>>, %arg4: memref<64x64xbf16, #tpu.memory_space<vmem>>, %arg5: memref<1x64xf32, #tpu.memory_space<vmem>>, %arg6: memref<1x1x8xf32, #tpu.memory_space<vmem>>) attributes {dimension_semantics = [#tpu.dimension_semantics<parallel>], iteration_bounds = array<i64: 1>, scalar_prefetch = 0 : i64, scratch_operands = 0 : i64, tpu.core_type = #tpu.core_type<tc>, window_params = [{transform_indices = @transform_0, window_bounds = array<i64: 8, 24>}, {pipeline_mode = #tpu.pipeline_mode<synchronous>, transform_indices = @transform_1, window_bounds = array<i64: 24, 64>}, {pipeline_mode = #tpu.pipeline_mode<synchronous>, transform_indices = @transform_2, window_bounds = array<i64: 1, 64>}, {pipeline_mode = #tpu.pipeline_mode<synchronous>, transform_indices = @transform_3, window_bounds = array<i64: 64, 64>}, {pipeline_mode = #tpu.pipeline_mode<synchronous>, transform_indices = @transform_4, window_bounds = array<i64: 1, 64>}, {transform_indices = @transform_5, window_bounds = array<i64: 1, 1, 8>}]} {
    %c0 = arith.constant 0 : index
    %c0_0 = arith.constant 0 : index
    %0 = vector.load %arg1[%c0, %c0_0] : memref<8x24xf32, #tpu.memory_space<vmem>>, vector<8x24xf32>
    %1 = arith.truncf %0 : vector<8x24xf32> to vector<8x24xbf16>
    %c0_1 = arith.constant 0 : index
    %c0_2 = arith.constant 0 : index
    %2 = vector.load %arg2[%c0_1, %c0_2] : memref<24x64xbf16, #tpu.memory_space<vmem>>, vector<24x64xbf16>
    %cst = arith.constant dense<0.000000e+00> : vector<8x64xf32>
    %3 = tpu.matmul %1, %2, %cst {dimension_numbers = #tpu.dot_dimension_numbers<[1], [0], [0], [1], [0, 0, 1, 1], [], []>} : vector<8x24xbf16>, vector<24x64xbf16>, vector<8x64xf32> -> vector<8x64xf32>
    %c0_3 = arith.constant 0 : index
    %c0_4 = arith.constant 0 : index
    %4 = vector.load %arg3[%c0_3, %c0_4] : memref<1x64xf32, #tpu.memory_space<vmem>>, vector<1x64xf32>
    %5 = vector.broadcast %4 : vector<1x64xf32> to vector<8x64xf32>
    %6 = arith.addf %3, %5 : vector<8x64xf32>
    %cst_5 = arith.constant 0.000000e+00 : f32
    %7 = vector.broadcast %cst_5 : f32 to vector<8x64xf32>
    %8 = arith.maximumf %6, %7 : vector<8x64xf32>
    %9 = arith.truncf %8 : vector<8x64xf32> to vector<8x64xbf16>
    %c0_6 = arith.constant 0 : index
    %c0_7 = arith.constant 0 : index
    %10 = vector.load %arg4[%c0_6, %c0_7] : memref<64x64xbf16, #tpu.memory_space<vmem>>, vector<64x64xbf16>
    %cst_8 = arith.constant dense<0.000000e+00> : vector<8x64xf32>
    %11 = tpu.matmul %9, %10, %cst_8 {dimension_numbers = #tpu.dot_dimension_numbers<[1], [0], [0], [1], [0, 0, 1, 1], [], []>} : vector<8x64xbf16>, vector<64x64xbf16>, vector<8x64xf32> -> vector<8x64xf32>
    %c0_9 = arith.constant 0 : index
    %c0_10 = arith.constant 0 : index
    %12 = vector.load %arg5[%c0_9, %c0_10] : memref<1x64xf32, #tpu.memory_space<vmem>>, vector<1x64xf32>
    %13 = vector.broadcast %12 : vector<1x64xf32> to vector<8x64xf32>
    %14 = arith.addf %11, %13 : vector<8x64xf32>
    %15 = vector.extract_strided_slice %14 {offsets = [0, 0], sizes = [8, 32], strides = [1, 1]} : vector<8x64xf32> to vector<8x32xf32>
    %16 = vector.extract_strided_slice %14 {offsets = [0, 32], sizes = [8, 32], strides = [1, 1]} : vector<8x64xf32> to vector<8x32xf32>
    %17 = arith.mulf %15, %16 : vector<8x32xf32>
    %cst_11 = arith.constant dense<0.000000e+00> : vector<8xf32>
    %18 = vector.multi_reduction <add>, %17, %cst_11 [1] : vector<8x32xf32> to vector<8xf32>
    %19 = vector.shape_cast %18 : vector<8xf32> to vector<1x1x8xf32>
    %c0_12 = arith.constant 0 : index
    %c0_13 = arith.constant 0 : index
    %c0_14 = arith.constant 0 : index
    %20 = vector.load %arg6[%c0_12, %c0_13, %c0_14] : memref<1x1x8xf32, #tpu.memory_space<vmem>>, vector<1x1x8xf32>
    tpu.vector_store %arg6[%c0_12, %c0_13, %c0_14], %19 {strides = array<i32>} : memref<1x1x8xf32, #tpu.memory_space<vmem>>, vector<1x1x8xf32>,
    return
  }
  func.func @transform_0(%arg0: i32) -> (i32, i32) {
    %c0_i32 = arith.constant 0 : i32
    %c0_i32_0 = arith.constant 0 : i32
    return %arg0, %c0_i32 : i32, i32
  }
  func.func @transform_1(%arg0: i32) -> (i32, i32) {
    %c0_i32 = arith.constant 0 : i32
    %c0_i32_0 = arith.constant 0 : i32
    %c0_i32_1 = arith.constant 0 : i32
    return %c0_i32, %c0_i32_0 : i32, i32
  }
  func.func @transform_2(%arg0: i32) -> (i32, i32) {
    %c0_i32 = arith.constant 0 : i32
    %c0_i32_0 = arith.constant 0 : i32
    %c0_i32_1 = arith.constant 0 : i32
    return %c0_i32, %c0_i32_0 : i32, i32
  }
  func.func @transform_3(%arg0: i32) -> (i32, i32) {
    %c0_i32 = arith.constant 0 : i32
    %c0_i32_0 = arith.constant 0 : i32
    %c0_i32_1 = arith.constant 0 : i32
    return %c0_i32, %c0_i32_0 : i32, i32
  }
  func.func @transform_4(%arg0: i32) -> (i32, i32) {
    %c0_i32 = arith.constant 0 : i32
    %c0_i32_0 = arith.constant 0 : i32
    %c0_i32_1 = arith.constant 0 : i32
    return %c0_i32, %c0_i32_0 : i32, i32
  }
  func.func @transform_5(%arg0: i32) -> (i32, i32, i32) {
    %c0_i32 = arith.constant 0 : i32
    %c0_i32_0 = arith.constant 0 : i32
    %c0_i32_1 = arith.constant 0 : i32
    return %arg0, %c0_i32, %c0_i32_0 : i32, i32, i32
  }
}

</mosaic_0001>

<bundles_post_ra>
// kernel: deeponet_apply.1
= control target key start
LH: loop header
LB: loop body
LE: loop exit
PB: predicated region body
PF: predicated region fallthrough
CT: control target
= control target key end

     0   :  { %10 = vsyncpa [#allocation3], 0  ;;  %s405_s0 = inlined_call_operand.vmem [shape: f32[8,24], index: 0, kind: input, shape index: {}]   ;;  %s406_s1 = inlined_call_operand.hbm [shape: bf16[24,64], index: 1, kind: input, shape index: {}]   ;;  %s407_s2 = inlined_call_operand.vmem [shape: f32[1,64], index: 2, kind: input, shape index: {}]   ;;  %s408_s3 = inlined_call_operand.vmem [shape: bf16[64,64], index: 3, kind: input, shape index: {}]   ;;  %s409_s4 = inlined_call_operand.vmem [shape: f32[1,64], index: 4, kind: input, shape index: {}]   ;;  %s410_s5 = inlined_call_operand.hbm [shape: f32[1,1,8], index: 5, kind: output, shape index: {}]  }
   0x1   :  { %11 = vsyncpa [#allocation4], 0  ;;  %s323_s18 = smov [#allocation2]   ;;  %s275_s22 = scalar_lea.hbm %s406_s1, 192 }
   0x2   :  { %s19_s19 = sshll.u32 %s323_s18, 4  ;;  %p276_p0 = scmp.ne.s32.totalorder %s406_s1, %s275_s22  ;;  %s20_s19 = int_to_ptr.vmem [resolvable:$true] %s19_s19 }
   0x3   :  { %p279_p1 = scmp.lt.u32.totalorder %s275_s22, %s406_s1 }
   0x5   :  { %p281_p2 = pnand %p279_p1, %p276_p0 }
   0x7   :  { %284 = shalt.err (!%p281_p2)
}
   0x8   :  { %s285_s27 = scalar_lea.vmem %s20_s19, 192  ;;  %p290_p4 = scmp.lt.s32.totalorder %s20_s19, %s20_s19 }
   0x9   :  { %p286_p3 = scmp.ne.s32.totalorder %s20_s19, %s285_s27  ;;  %p291_p5 = scmp.lt.s32.totalorder %s285_s27, %s285_s27 }
   0xb   :  { %p292_p6 = por %p291_p5, %p290_p4 }
   0xd   :  { %p293_p7 = pnand %p292_p6, %p286_p3 }
   0xf   :  { %296 = shalt.err (!%p293_p7)
}
  0x10   :  { %s324_s28 = smov 64   ;;  %s325_s29 = smov 4  }
  0x11   :  { %25 = dma.hbm_to_vmem [thread:$0]  %s406_s1, 192, %s20_s19, [#allocation3], %s324_s28, %s324_s28, %s325_s29  }
  0x12   :  { %319 = dma.done.wait [#allocation3], 192  }
  0x13   :  { %320 = vsyncadd [#allocation3], 4294967104  ;;  %v326_v0 = vmov 0.0   ;;  %vm327_vm0 = vmmov 0   ;;  %v269_v1 = vld [vmem:[#allocation2] sm:$0xff]   ;;  %vm61_vm1 = vcmask 1043456   ;;  %v200_v27 = vlaneseq }
  0x14   :  { %242 = vmatprep.subr.bf16.mxu0 %v326_v0  ;;  %246 = vmatprep.mubr.msk.bf16.mxu0 %vm327_vm0, %v326_v0  ;;  %v270_v2 = vld [vmem:[#allocation2 + $0x8] ss:$0 sps:$4 sm:$0xff]   ;;  %v36_v3 = vld [vmem:[%s405_s0] sm:$0xff]  ;;  %v272_v6 = vld [vmem:[%s408_s3 + $0x8] sm:$0xff]   ;;  %vm57_vm2 = vcmask 195584   ;;  %vm146_vm3 = vcmask 523264  }
  0x15   :  { %250 = vmatprep.subr.bf16.mxu1 %v326_v0  ;;  %258 = vmatprep.mubr.msk.bf16.mxu1 %vm327_vm0, %v326_v0  ;;  %v271_v4 = vld [vmem:[%s408_s3] sm:$0xff]   ;;  %v63_v5 = vsel %vm61_vm1, %v270_v2, 0  ;;  %v37_v7 = vpack.c.bf16 %v36_v3, %v36_v3  ;;  %v273_v8 = vld [vmem:[%s408_s3 + $0x10] sm:$0xff]   ;;  %v274_v9 = vld [vmem:[%s408_s3 + $0x18] sm:$0xff]   ;;  %s328_s3 = smov 96   ;;  %vm195_vm4 = vcmask 261120  }
  0x16   :  { %243 = vmatpush3.bf16.msra.mxu0 %v269_v1  ;;  %251 = vmatpush3.bf16.msra.mxu1 %v271_v4  ;;  %v224_v10 = vld [vmem:[%s407_s2] ss:$0 sm:$0xff]  ;;  %v201_v28 = vand.u32 127, %v200_v27  ;;  %v203_v29 = vshrl.u32 %v200_v27, 7  ;;  %s329_s2 = smov [#allocation5]   ;;  %vm207_vm5 = vcmask 57344  }
  0x17   :  { %244 = vmatprep.subr.bf16.mxu0 %v326_v0  ;;  %252 = vmatprep.subr.bf16.mxu1 %v326_v0  ;;  %v228_v18 = vld [vmem:[%s409_s4] ss:$0 sm:$0xff]  ;;  %s215_s19 = sshll.u32 %s329_s2, 4  ;;  %s216_s19 = int_to_ptr.vmem [resolvable:$true] %s215_s19 }
  0x18   :  { %v204_v30 = vsub.s32 %v201_v28, %v203_v29  ;;  %s297_s4 = scalar_lea.vmem %s216_s19, 16  ;;  %s301_s20 = scalar_lea.vmem %s216_s19, 32 }
  0x19   :  { %p298_p8 = scmp.ne.s32.totalorder %s216_s19, %s297_s4  ;;  %p302_p9 = scmp.lt.s32.totalorder %s216_s19, %s216_s19 }
  0x1a   :  { %245 = vmatpush3.bf16.msra.mxu0 %v63_v5  ;;  %253 = vmatpush3.bf16.msra.mxu1 %v272_v6  ;;  %p303_p10 = scmp.lt.s32.totalorder %s301_s20, %s297_s4 }
  0x1b   :  { %254 = vmatprep.subr.bf16.mxu1 %v326_v0 }
  0x1c   :  { %p304_p11 = por %p303_p10, %p302_p9 }
  0x1d   :  { %247 = vmatmul.mubr.msk.bf16.vlgmr.msra.gmra.mrb[0].mxu0 %vm57_vm2, %v37_v7 }
  0x1e   :  { %255 = vmatpush3.bf16.msra.mxu1 %v273_v8  ;;  %p305_p12 = pnand %p304_p11, %p298_p8 }
  0x1f   :  { %256 = vmatprep.subr.bf16.mxu1 %v326_v0 }
  0x22   :  { %257 = vmatpush3.bf16.msra.mxu1 %v274_v9 }
  0xf0   :  { %v99_v11 = vpop.f32.mrb[0].mxu0 }
  0xf1   :  { %v100_v12 = vadd.f32 %v224_v10, %v99_v11  ;;  %v248_v13 = vpop.f32.mrb[1].mxu0 }
  0xf2   :  { %v102_v14 = vpop.f32.mrb[2].mxu0 }
  0xf3   :  { %v105_v15 = vmax.f32 %v100_v12, 0.0  ;;  %v249_v16 = vpop.f32.mrb[3].mxu0 }
  0xf5   :  { %v106_v17 = vpack.c.bf16 %v105_v15, %v105_v15 }
  0xf7   :  { %259 = vmatmul.mubr.msk.bf16.vlgmr.msra.gmra.mrb[0].mxu1 %vm146_vm3, %v106_v17 }
 0x1ca   :  { %v184_v19 = vpop.f32.mrb[0].mxu1 }
 0x1cb   :  { %v185_v20 = vadd.f32 %v228_v18, %v184_v19  ;;  %v260_v21 = vpop.f32.mrb[1].mxu1 }
 0x1cc   :  { %v187_v22 = vpop.f32.mrb[2].mxu1 }
 0x1cd   :  { %191 = vrot.lane.b32.xlu0 %v185_v20, %s328_s3  ;;  %v261_v23 = vpop.f32.mrb[3].mxu1 }
 0x23f   :  { %v192_v24 = vpop.permute.xlu0 %191 }
 0x240   :  { %v194_v25 = vmul.f32 %v192_v24, %v185_v20 }
 0x242   :  { %v196_v26 = vsel %vm195_vm4, %v194_v25, 0.0 }
 0x243   :  { %197 = vadd.xlane.f32.xlu0 %v196_v26 }
 0x2d0   :  { %v198_v31 = vpop.xlane.xlu0 %197 }
 0x2d1   :  { %v205_v32 = vrot.slane %v198_v31, %v204_v30 }
 0x2d3   :  { %208 = vst.msk [vmem:[#allocation5] sm:$0x1] %vm207_vm5, %v205_v32 }
 0x2d4   :  { %308 = shalt.err (!%p305_p12)
}
 0x2d5   :  { %s309_s23 = scalar_lea.hbm %s410_s5, 16 }
 0x2d6   :  { %p310_p13 = scmp.ne.s32.totalorder %s410_s5, %s309_s23  ;;  %p313_p0 = scmp.lt.u32.totalorder %s309_s23, %s410_s5 }
 0x2d8   :  { %p315_p1 = pnand %p313_p0, %p310_p13 }
 0x2da   :  { %318 = shalt.err (!%p315_p1)
}
 0x2db   :  { %218 = dma.vmem_to_hbm [thread:$0]  %s216_s19, 16, %s410_s5, [#allocation4]  }
 0x2dc   :  { %321 = dma.done.wait [#allocation4], 16  }
 0x2dd   :  { %322 = vsyncadd [#allocation4], 4294967280 }
 0x2de   :  { %222 = vsyncpa [#allocation3], 1 }
 0x2df   :  { %223 = vsyncpa [#allocation4], 1 }

</bundles_post_ra>
